<compile_context>
chip_gen: v7x
topology: tpu7x:2x2x1
jax: 0.10.0
libtpu: 0.0.40
codegen_flags: <defaults>
</compile_context>

<pallas_src>
import functools

import jax
import jax.numpy as jnp
from jax.experimental import pallas as pl
from jax.experimental.pallas import tpu as pltpu


def _round_down(x, q):
    return (x // q) * q


def _cdiv(a, b):
    return -(-a // b)


def _mask_cols_kernel(x_ref, o_ref, *, start, end, tl, period):
    """Zero lane-columns of a (rows, lanes) tile.

    period is None -> zero the contiguous lane range [start, end)
    period = W     -> zero lanes whose (lane % W) falls in [start, end)
    """
    base = pl.program_id(1) * tl
    # 1-D iota on the masked (lane) axis only; broadcast against the tile.
    col = jax.lax.broadcasted_iota(jnp.int32, (1, tl), 1) + base
    if period is not None:
        col = col % period
    keep = jnp.logical_or(col < start, col >= end)               # (1, tl)
    o_ref[...] = jnp.where(keep, x_ref[...], jnp.array(0, dtype=x_ref.dtype))


def _choose_tiles(rows, lanes, itemsize, block_bytes):
    """Budget-driven (rows, lanes) tile: one block when the whole matrix fits,
    otherwise lane-dense ~block_bytes tiles balanced across the grid."""
    sub_q = max(8, 32 // itemsize)               # dtype-aware sublane quantum
    if rows * lanes * itemsize <= block_bytes:
        return rows, lanes
    tl_budget = max(128, _round_down(block_bytes // max(rows * itemsize, 1), 128))
    if lanes <= tl_budget:
        tl = lanes
    else:
        n_lane_tiles = _cdiv(lanes, tl_budget)
        tl = _cdiv(_cdiv(lanes, n_lane_tiles), 128) * 128        # balanced grid
    tr_budget = max(sub_q, _round_down(block_bytes // max(tl * itemsize, 1), sub_q))
    tr = rows if rows <= tr_budget else tr_budget
    return tr, tl


def _mask_cols(mat, start, end, *, period=None, block_bytes=4 << 20):
    """out[r, c] = 0 where column c is in the masked band, else mat[r, c]."""
    rows, lanes = mat.shape
    itemsize = jnp.dtype(mat.dtype).itemsize
    tr, tl = _choose_tiles(rows, lanes, itemsize, block_bytes)
    grid = (_cdiv(rows, tr), _cdiv(lanes, tl))

    # Input-DMA elision (contiguous band only): lane tiles fully inside
    # [start, end) write all-zeros regardless of input contents, so park their
    # input block index on the previous tile; Pallas skips the re-fetch when
    # consecutive grid steps map to the same block.
    lane_map = lambda j: j
    if period is None and end > start:
        n_j = grid[1]
        j_lo = _cdiv(start, tl)                      # first fully-masked tile
        j_hi = end // tl - 1                         # last fully-masked tile
        if end >= lanes:
            j_hi = n_j - 1
        j_hi = min(j_hi, n_j - 1)
        if j_hi >= j_lo:
            park = max(j_lo - 1, 0)

            def lane_map(j, _lo=j_lo, _hi=j_hi, _park=park):
                fully = jnp.logical_and(j >= _lo, j <= _hi)
                return jnp.where(fully, jnp.int32(_park), j)

    kernel = functools.partial(
        _mask_cols_kernel, start=start, end=end, tl=tl, period=period)
    return pl.pallas_call(
        kernel,
        out_shape=jax.ShapeDtypeStruct((rows, lanes), mat.dtype),
        grid=grid,
        in_specs=[pl.BlockSpec((tr, tl), lambda i, j: (i, lane_map(j)))],
        out_specs=pl.BlockSpec((tr, tl), lambda i, j: (i, j)),
        compiler_params=pltpu.CompilerParams(
            dimension_semantics=("parallel", "parallel"),
            vmem_limit_bytes=32 << 20),
    )(mat)


def mask_line(image, class_ind, count_classes, axis=0, *, block_bytes=4 << 20):
    """Pallas equivalent of MaskLine.forward.  image: (C, H, W).

    interval = (H or W) // count_classes truncates, matching the PyTorch
    module — trailing rows/cols are never maskable when it doesn't divide.
    """
    c, h, w = image.shape
    mat = image.reshape(c, h * w)                    # lane-dense for BOTH axes
    if axis == 0:
        interval = h // count_classes
        start, end = class_ind * interval * w, (class_ind + 1) * interval * w
        out = _mask_cols(mat, start, end, period=None, block_bytes=block_bytes)
    else:
        interval = w // count_classes
        start, end = class_ind * interval, (class_ind + 1) * interval
        out = _mask_cols(mat, start, end, period=w, block_bytes=block_bytes)
    return out.reshape(c, h, w)


def mask_line_ref(image, class_ind, count_classes, axis=0):
    """Pure-JAX reference mirroring the PyTorch forward."""
    c, h, w = image.shape
    mask = jnp.ones_like(image)
    if axis == 0:
        interval = h // count_classes
        mask = mask.at[:, class_ind * interval:(class_ind + 1) * interval, :].set(0)
    else:
        interval = w // count_classes
        mask = mask.at[:, :, class_ind * interval:(class_ind + 1) * interval].set(0)
    return image * mask


if __name__ == "__main__":
    key = jax.random.PRNGKey(0)

    def check(shape, class_ind, count_classes, axis, **kw):
        img = jax.random.normal(key, shape, dtype=jnp.float32)
        out = jax.block_until_ready(
            mask_line(img, class_ind, count_classes, axis=axis, **kw))
        ref = mask_line_ref(img, class_ind, count_classes, axis=axis)
        assert jnp.allclose(out, ref), f"mismatch shape={shape} axis={axis} kw={kw}"

    # The PyTorch module hard-codes 3 channels (torch.zeros([3, ...])).
    # Single-block path (whole matrix fits the block budget).
    check((3, 16, 16), 1, 4, axis=0)
    check((3, 16, 16), 1, 4, axis=1)
    # Multi-tile path via a tiny block budget: exercises the balanced lane
    # tiling, input-DMA elision (axis=0) and the periodic mask (axis=1).
    check((3, 32, 40), 1, 4, axis=0, block_bytes=2048)
    check((3, 32, 40), 1, 4, axis=1, block_bytes=2048)
    # Ragged tail tile (H*W not a multiple of the 128-lane tile).
    check((3, 10, 25), 1, 4, axis=0, block_bytes=1024)

    print("KERNEL_OK")
</pallas_src>

<mosaic_0001>
module attributes {stable_mosaic.version = 11 : i64} {
  func.func @_mask_cols_kernel(%arg0: i32, %arg1: i32, %arg2: memref<3x256xf32, #tpu.memory_space<vmem>>, %arg3: memref<3x256xf32, #tpu.memory_space<vmem>>) attributes {dimension_semantics = [#tpu.dimension_semantics<parallel>, #tpu.dimension_semantics<parallel>], iteration_bounds = array<i64: 1, 1>, scalar_prefetch = 0 : i64, scratch_operands = 0 : i64, tpu.core_type = #tpu.core_type<tc>, window_params = [{transform_indices = @transform_0, window_bounds = array<i64: 3, 256>}, {transform_indices = @transform_1, window_bounds = array<i64: 3, 256>}]} {
    %c256_i32 = arith.constant 256 : i32
    %0 = arith.muli %arg1, %c256_i32 : i32
    %1 = tpu.iota {dimensions = array<i32: 1>} : vector<1x256xi32>
    %2 = vector.broadcast %0 : i32 to vector<1x256xi32>
    %3 = arith.addi %1, %2 : vector<1x256xi32>
    %c64_i32 = arith.constant 64 : i32
    %4 = vector.broadcast %c64_i32 : i32 to vector<1x256xi32>
    %5 = arith.cmpi slt, %3, %4 : vector<1x256xi32>
    %c128_i32 = arith.constant 128 : i32
    %6 = vector.broadcast %c128_i32 : i32 to vector<1x256xi32>
    %7 = arith.cmpi sge, %3, %6 : vector<1x256xi32>
    %8 = arith.ori %5, %7 : vector<1x256xi1>
    %c0 = arith.constant 0 : index
    %c0_0 = arith.constant 0 : index
    %9 = vector.load %arg2[%c0, %c0_0] : memref<3x256xf32, #tpu.memory_space<vmem>>, vector<3x256xf32>
    %cst = arith.constant 0.000000e+00 : f32
    %10 = vector.shape_cast %8 : vector<1x256xi1> to vector<1x256xi1>
    %11 = vector.broadcast %10 : vector<1x256xi1> to vector<3x256xi1>
    %12 = vector.broadcast %cst : f32 to vector<3x256xf32>
    %13 = arith.select %11, %9, %12 : vector<3x256xi1>, vector<3x256xf32>
    %c0_1 = arith.constant 0 : index
    %c0_2 = arith.constant 0 : index
    %14 = vector.load %arg3[%c0_1, %c0_2] : memref<3x256xf32, #tpu.memory_space<vmem>>, vector<3x256xf32>
    tpu.vector_store %arg3[%c0_1, %c0_2], %13 {strides = array<i32>} : memref<3x256xf32, #tpu.memory_space<vmem>>, vector<3x256xf32>,
    return
  }
  func.func @transform_0(%arg0: i32, %arg1: i32) -> (i32, i32) {
    %c0_i32 = arith.constant 0 : i32
    return %arg0, %arg1 : i32, i32
  }
  func.func @transform_1(%arg0: i32, %arg1: i32) -> (i32, i32) {
    %c0_i32 = arith.constant 0 : i32
    return %arg0, %arg1 : i32, i32
  }
}

</mosaic_0001>

<bundles_post_ra>
// kernel: tpu_custom_call.1
= control target key start
LH: loop header
LB: loop body
LE: loop exit
PB: predicated region body
PF: predicated region fallthrough
CT: control target
= control target key end

     0   :  { %6 = vsyncpa [#allocation3], 0  ;;  %s151_s0 = inlined_call_operand.hbm [shape: f32[3,256], index: 0, kind: input, shape index: {}]   ;;  %s152_s1 = inlined_call_operand.hbm [shape: f32[3,256], index: 1, kind: output, shape index: {}]  }
   0x1   :  { %7 = vsyncpa [#allocation4], 0  ;;  %s115_s6 = smov [#allocation2]   ;;  %s67_s10 = scalar_lea.hbm %s151_s0, 128 }
   0x2   :  { %s14_s7 = sshll.u32 %s115_s6, 4  ;;  %p68_p0 = scmp.ne.s32.totalorder %s151_s0, %s67_s10  ;;  %s15_s7 = int_to_ptr.vmem [resolvable:$true] %s14_s7 }
   0x3   :  { %p71_p1 = scmp.lt.u32.totalorder %s67_s10, %s151_s0 }
   0x5   :  { %p73_p2 = pnand %p71_p1, %p68_p0 }
   0x7   :  { %76 = shalt.err (!%p73_p2)
}
   0x8   :  { %s77_s15 = scalar_lea.vmem %s15_s7, 128  ;;  %p82_p4 = scmp.lt.s32.totalorder %s15_s7, %s15_s7 }
   0x9   :  { %p78_p3 = scmp.ne.s32.totalorder %s15_s7, %s77_s15  ;;  %p83_p5 = scmp.lt.s32.totalorder %s77_s15, %s77_s15 }
   0xb   :  { %p84_p6 = por %p83_p5, %p82_p4 }
   0xd   :  { %p85_p7 = pnand %p84_p6, %p78_p3 }
   0xf   :  { %88 = shalt.err (!%p85_p7)
}
  0x10   :  { %17 = dma.hbm_to_vmem [thread:$0]  %s151_s0, 128, %s15_s7, [#allocation3]  }
  0x11   :  { %111 = dma.done.wait [#allocation3], 128  }
  0x12   :  { %112 = vsyncadd [#allocation3], 4294967168  ;;  %v22_v0 = vlaneseq  ;;  %v34_v2 = vld [vmem:[#allocation2] sm:$0x77]  ;;  %s116_s18 = smov [#allocation5]  }
  0x13   :  { %s55_s19 = sshll.u32 %s116_s18, 4  ;;  %v40_v3 = vcombine.high %v34_v2, %v34_v2  ;;  %s56_s19 = int_to_ptr.vmem [resolvable:$true] %s55_s19 }
  0x14   :  { %v23_v1 = vand.u32 127, %v22_v0  ;;  %s89_s20 = scalar_lea.vmem %s56_s19, 128  ;;  %p94_p9 = scmp.lt.s32.totalorder %s56_s19, %s56_s19 }
  0x15   :  { %p90_p8 = scmp.ne.s32.totalorder %s56_s19, %s89_s20  ;;  %p95_p10 = scmp.lt.s32.totalorder %s89_s20, %s89_s20 }
  0x16   :  { %vm28_vm0 = vcmp.lt.s32.totalorder %v23_v1, 64 }
  0x17   :  { %v42_v4 = vsel %vm28_vm0, %v34_v2, 0.0  ;;  %p96_p11 = por %p95_p10, %p94_p9 }
  0x18   :  { %v46_v5 = vcombine.low %v42_v4, %v40_v3 }
  0x19   :  { %p97_p12 = pnand %p96_p11, %p90_p8 }
  0x1a   :  { %48 = vst [vmem:[#allocation5] sm:$0x77] %v46_v5 }
  0x1b   :  { %100 = shalt.err (!%p97_p12)
}
  0x1c   :  { %s101_s22 = scalar_lea.hbm %s152_s1, 128 }
  0x1d   :  { %p102_p13 = scmp.ne.s32.totalorder %s152_s1, %s101_s22  ;;  %p105_p0 = scmp.lt.u32.totalorder %s101_s22, %s152_s1 }
  0x1f   :  { %p107_p1 = pnand %p105_p0, %p102_p13 }
  0x21   :  { %110 = shalt.err (!%p107_p1)
}
  0x22   :  { %58 = dma.vmem_to_hbm [thread:$0]  %s56_s19, 128, %s152_s1, [#allocation4]  }
  0x23   :  { %113 = dma.done.wait [#allocation4], 128  }
  0x24   :  { %114 = vsyncadd [#allocation4], 4294967168 }
  0x25   :  { %62 = vsyncpa [#allocation3], 1 }
  0x26   :  { %63 = vsyncpa [#allocation4], 1 }

</bundles_post_ra>
